<compile_context>
chip_gen: v6e
topology: v6e:2x2x1
jax: 0.10.0
libtpu: 0.0.40
codegen_flags: <defaults>
</compile_context>

<pallas_src>
import jax
import jax.numpy as jnp
import numpy as np
from jax.experimental import pallas as pl
from jax.experimental.pallas import tpu as pltpu

# ----------------------------- hyper-parameters ------------------------------
HIDDEN = 64          # config.hidden_size (== emb_size so the rel-encoder path is consistent)
EMB = 64             # emb_size
BLOCK = 16           # block_size
NUM_LABELS = 8       # config.num_labels
LABEL_PAD = 128      # labels padded to full lane width for lane-dense stores
NHEAD = 8            # transformer-encoder heads
DFF = 128            # dim_feedforward (small stand-in for 2048)
N_DOCS = 2
SEQ = 64             # encoder sequence length c
HEADS_ATT = 4        # heads of the (synthetic) encoder attention output
PAIRS_PER_DOC = 16
NUM_RELS = 1
# Max pair-dim tile (production).  Toy problems collapse to one full-block step.
PAIR_TILE_MAX = 512
# Scoped VMEM budget.  v5e's default is only 16 MiB (of 128 physical); 32 MiB is
# the default on v6e/v7x and comfortably fits the toy working set.
VMEM_LIMIT = 32 * 1024 * 1024


def _round_up(x, m):
    return -(-x // m) * m


# =============================== Pallas kernels ===============================
def _rs_contract_kernel(att_ref, seq_ref, o_ref):
    # att_ref: (n, R, C) bf16   seq_ref: (n, C, H) bf16   o_ref: (n, R, H) bf16
    # contract('ld,rl->rd', seq_i, ht_att_i)  ==  ht_att_i @ seq_i  per doc
    # (bf16 MXU operands, f32 accumulation, bf16 writeback).
    o_ref[...] = jnp.einsum(
        'nrc,nch->nrh', att_ref[...], seq_ref[...],
        preferred_element_type=jnp.float32).astype(o_ref.dtype)


def rs_contract(ht_att, seq_out):
    """rs_i = ht_att_i @ seq_out_i for every doc, in a single grid step."""
    n, R, C = ht_att.shape
    H = seq_out.shape[-1]
    att16 = ht_att.astype(jnp.bfloat16)
    seq16 = seq_out.astype(jnp.bfloat16)
    cost = pl.CostEstimate(
        flops=2 * n * R * C * H,
        transcendentals=0,
        bytes_accessed=2 * n * (R * C + C * H + R * H))
    # TODO(synk): at production sizes fold (n, R) into the matmul M dimension,
    # tile M,N to >=128 (v5e) / 256 (v6e,v7x) and pad H to a 128-lane multiple.
    return pl.pallas_call(
        _rs_contract_kernel,
        out_shape=jax.ShapeDtypeStruct((n, R, H), jnp.bfloat16),
        grid=(1,),
        in_specs=[pl.BlockSpec((n, R, C), lambda i: (0, 0, 0)),
                  pl.BlockSpec((n, C, H), lambda i: (0, 0, 0))],
        out_specs=pl.BlockSpec((n, R, H), lambda i: (0, 0, 0)),
        compiler_params=pltpu.CompilerParams(
            dimension_semantics=("arbitrary",),     # single step: nothing to parallelize
            vmem_limit_bytes=VMEM_LIMIT),
        cost_estimate=cost,
    )(att16, seq16)


def _pair_fused_kernel(ht_ref, rs_ref, wht_ref, wr_ref, be_ref,
                       repi_ref, repj_ref, wbl_ref, bbl_ref, o_ref):
    """Fused head/tail extractor + block-bilinear + classifier for one pair tile.

    Extractor:  y = tanh([hss|tss] @ W_blockdiag + rs @ Wr + b)
      - [hss|tss] is a lane-dense (TN, 2*HIDDEN=128) input, W_blockdiag is
        (128, 2*EMB) with head/tail weights on the diagonal blocks, so one
        K=128 MXU matmul replaces two half-zero K=64 matmuls.
      - y[:, :E] == head_extractor([hss, rs]);  y[:, E:] == tail_extractor([tss, rs]).

    Bilinear:   P[n, k*B*B + i*B + j] = hs[n, kB+i] * ts[n, kB+j]
      - built with two constant 0/1 "repeat" matmuls of shape (2E, E*B) that
        also perform the hs/ts split (no unaligned lane slices of y at all),
        then a single elementwise multiply.
      - reduced against the lane-padded classifier weight with ONE K=E*B MXU
        matmul; output is a lane-dense (TN, 128) unmasked store.
    """
    y = jnp.dot(ht_ref[...], wht_ref[...], preferred_element_type=jnp.float32)
    y = y + jnp.dot(rs_ref[...], wr_ref[...], preferred_element_type=jnp.float32)
    y = jnp.tanh(y + be_ref[...]).astype(jnp.bfloat16)                  # (TN, 2E)

    h_rep = jnp.dot(y, repi_ref[...], preferred_element_type=jnp.float32)  # (TN, E*B)
    t_rep = jnp.dot(y, repj_ref[...], preferred_element_type=jnp.float32)  # (TN, E*B)
    p = (h_rep * t_rep).astype(jnp.bfloat16)                               # flat outer product
    o_ref[...] = (jnp.dot(p, wbl_ref[...], preferred_element_type=jnp.float32)
                  + bbl_ref[...])                                          # (TN, 128) f32


def prepare_pair_params(params, *, hidden=HIDDEN, emb=EMB, block=BLOCK,
                        n_labels=NUM_LABELS, lpad=LABEL_PAD):
    """One-time packing of extractor/classifier weights into kernel layout.

    Hoisted out of the forward path so the concats / pads / bf16 casts are not
    re-executed per call.
    """
    f16 = jnp.bfloat16
    hw, tw = params['head_w'], params['tail_w']                 # (2H, E) each
    zero = jnp.zeros((hidden, emb), jnp.float32)
    w_ht = jnp.concatenate(
        [jnp.concatenate([hw[:hidden], zero], axis=1),          # hss -> hs half
         jnp.concatenate([zero, tw[:hidden]], axis=1)],         # tss -> ts half
        axis=0).astype(f16)                                     # (2H, 2E) block-diagonal
    w_r = jnp.concatenate([hw[hidden:], tw[hidden:]], axis=1).astype(f16)   # (H, 2E)
    b_e = jnp.concatenate([params['head_b'], params['tail_b']])[None, :]    # (1, 2E) f32

    # Repeat matrices: column a = k*B*B + i*B + j selects hs[kB+i] / ts[kB+j].
    rep_i = jnp.repeat(jnp.eye(emb, dtype=jnp.float32), block, axis=1)      # (E, E*B)
    rep_j = jnp.kron(jnp.eye(emb // block, dtype=jnp.float32),
                     jnp.tile(jnp.eye(block, dtype=jnp.float32), (1, block)))  # (E, E*B)
    zrow = jnp.zeros((emb, emb * block), jnp.float32)
    rep_i2 = jnp.concatenate([rep_i, zrow], axis=0).astype(f16)  # (2E, E*B): picks hs half
    rep_j2 = jnp.concatenate([zrow, rep_j], axis=0).astype(f16)  # (2E, E*B): picks ts half

    w_bl = jnp.zeros((emb * block, lpad), jnp.float32)
    w_bl = w_bl.at[:, :n_labels].set(jnp.transpose(params['bil_w'])).astype(f16)
    b_bl = jnp.zeros((1, lpad), jnp.float32).at[0, :n_labels].set(params['bil_b'])
    return dict(w_ht=w_ht, w_r=w_r, b_e=b_e, rep_i=rep_i2, rep_j=rep_j2,
                w_bl=w_bl, b_bl=b_bl)


def pair_logits(hss, tss, rs, packed, *, hidden=HIDDEN, emb=EMB, block=BLOCK,
                n_labels=NUM_LABELS, lpad=LABEL_PAD, tile_max=PAIR_TILE_MAX):
    """One fused pallas_call: tanh extractors + block-bilinear + classifier."""
    n_pairs = hss.shape[0]
    f16 = jnp.bfloat16
    eb = emb * block

    # lane-dense [hss|tss] input (2*HIDDEN = 128 lanes) + bf16 cast
    ht = jnp.concatenate([hss, tss], axis=1).astype(f16)        # (N, 2H)
    rs16 = rs.astype(f16)                                       # (N, H)

    # Toy shapes -> single full-block grid step; production -> 512-row tiles.
    tile_n = min(tile_max, _round_up(n_pairs, 8))
    n_pad = _round_up(n_pairs, tile_n)
    if n_pad != n_pairs:
        # Padded rows flow through tanh(bias)+classifier and produce nonzero
        # logits; harmless because the wrapper slices [:n_pairs] below.
        ht = jnp.pad(ht, ((0, n_pad - n_pairs), (0, 0)))
        rs16 = jnp.pad(rs16, ((0, n_pad - n_pairs), (0, 0)))

    grid = (n_pad // tile_n,)
    flops = n_pad * (2 * 2 * hidden * 2 * emb     # [hss|tss] @ W_blockdiag
                     + 2 * hidden * 2 * emb       # rs @ Wr
                     + 2 * 2 * 2 * emb * eb       # two repeat matmuls
                     + 2 * eb * lpad)             # classifier
    cost = pl.CostEstimate(
        flops=flops,
        transcendentals=n_pad * 2 * emb,
        bytes_accessed=(n_pad * (2 * hidden + hidden) * 2 + n_pad * lpad * 4
                        + (2 * hidden + hidden) * 2 * emb * 2
                        + 2 * (2 * emb) * eb * 2 + eb * lpad * 2
                        + 2 * emb * 4 + lpad * 4))

    tiled = lambda i: (i, 0)
    full = lambda i: (0, 0)
    # TODO(synk): at production (emb=768, block=64) the flat E*B outer product
    # (and the full classifier weight) no longer fits VMEM; switch the feature
    # blocks to a grid axis marked "arbitrary" with a (block*block, lpad) weight
    # BlockSpec slice per step and a pltpu.VMEM scratch f32 accumulator.
    out = pl.pallas_call(
        _pair_fused_kernel,
        out_shape=jax.ShapeDtypeStruct((n_pad, lpad), jnp.float32),
        grid=grid,
        in_specs=[pl.BlockSpec((tile_n, 2 * hidden), tiled),     # [hss|tss]
                  pl.BlockSpec((tile_n, hidden), tiled),         # rs
                  pl.BlockSpec((2 * hidden, 2 * emb), full),     # W block-diagonal
                  pl.BlockSpec((hidden, 2 * emb), full),         # Wr
                  pl.BlockSpec((1, 2 * emb), full),              # extractor bias
                  pl.BlockSpec((2 * emb, eb), full),             # rep_i (hs picker)
                  pl.BlockSpec((2 * emb, eb), full),             # rep_j (ts picker)
                  pl.BlockSpec((eb, lpad), full),                # classifier weight (padded)
                  pl.BlockSpec((1, lpad), full)],                # classifier bias (padded)
        out_specs=pl.BlockSpec((tile_n, lpad), tiled),
        compiler_params=pltpu.CompilerParams(
            dimension_semantics=(("parallel",) if grid[0] > 1 else ("arbitrary",)),
            vmem_limit_bytes=VMEM_LIMIT),
        cost_estimate=cost,
    )(ht, rs16, packed['w_ht'], packed['w_r'], packed['b_e'],
      packed['rep_i'], packed['rep_j'], packed['w_bl'], packed['b_bl'])
    return out[:n_pairs, :n_labels]


# ================================= JAX glue ==================================
def get_hrt_glue(seq_out, attention, entity_pos, hts, offset=1):
    """Ragged entity pooling (logsumexp embeddings / mean attentions) — glue.

    TODO(synk): at production sizes this becomes a PrefetchScalarGridSpec Pallas
    gather kernel (entity offsets + hts table in SMEM, row gathers from HBM).
    """
    n, C, H = seq_out.shape
    h = attention.shape[1]
    hss, tss, ht_atts = [], [], []
    for i in range(n):
        entity_embs, entity_atts = [], []
        for e in entity_pos[i]:
            if len(e) > 1:
                e_emb_l, e_att_l = [], []
                for (start, _end) in e:
                    if start + offset < C:
                        e_emb_l.append(seq_out[i, start + offset])
                        e_att_l.append(attention[i, :, start + offset])
                if e_emb_l:
                    e_emb = jax.nn.logsumexp(jnp.stack(e_emb_l, 0), axis=0)
                    e_att = jnp.stack(e_att_l, 0).mean(0)
                else:
                    e_emb = jnp.zeros((H,), seq_out.dtype)
                    e_att = jnp.zeros((h, C), attention.dtype)
            else:
                start, _end = e[0]
                if start + offset < C:
                    e_emb = seq_out[i, start + offset]
                    e_att = attention[i, :, start + offset]
                else:
                    e_emb = jnp.zeros((H,), seq_out.dtype)
                    e_att = jnp.zeros((h, C), attention.dtype)
            entity_embs.append(e_emb)
            entity_atts.append(e_att)
        entity_embs = jnp.stack(entity_embs, 0)     # (E_i, H)
        entity_atts = jnp.stack(entity_atts, 0)     # (E_i, h, C)
        ht = jnp.asarray(hts[i], dtype=jnp.int32)   # (R, 2)
        hs = entity_embs[ht[:, 0]]
        ts = entity_embs[ht[:, 1]]
        h_att = entity_atts[ht[:, 0]]
        t_att = entity_atts[ht[:, 1]]
        ht_att = (h_att * t_att).mean(1)            # (R, C)
        ht_att = ht_att / (ht_att.sum(1, keepdims=True) + 1e-5)
        hss.append(hs)
        tss.append(ts)
        ht_atts.append(ht_att)
    return (jnp.concatenate(hss, 0),
            jnp.concatenate(tss, 0),
            jnp.stack(ht_atts, 0))                  # (n, R, C)


def layer_norm(x, scale, bias, eps=1e-5):
    mu = x.mean(-1, keepdims=True)
    var = ((x - mu) ** 2).mean(-1, keepdims=True)
    return (x - mu) * jax.lax.rsqrt(var + eps) * scale + bias


def transformer_encoder_layer(x, p):
    # x: (S, Bb, D) in PyTorch's (seq, batch, d_model) convention, post-norm, ReLU FFN.
    S, Bb, D = x.shape
    dh = D // NHEAD
    q = (x @ p['Wq'] + p['bq']).reshape(S, Bb, NHEAD, dh)
    k = (x @ p['Wk'] + p['bk']).reshape(S, Bb, NHEAD, dh)
    v = (x @ p['Wv'] + p['bv']).reshape(S, Bb, NHEAD, dh)
    scores = jnp.einsum('sbhd,tbhd->bhst', q, k) / jnp.sqrt(jnp.float32(dh))
    attn = jax.nn.softmax(scores, axis=-1)
    ctx = jnp.einsum('bhst,tbhd->sbhd', attn, v).reshape(S, Bb, D)
    x = layer_norm(x + (ctx @ p['Wo'] + p['bo']), p['ln1_s'], p['ln1_b'])
    ff = jax.nn.relu(x @ p['W1'] + p['b1']) @ p['W2'] + p['b2']
    return layer_norm(x + ff, p['ln2_s'], p['ln2_b'])


def at_loss_get_label(logits, num_labels=-1):
    """ATLoss.get_label (inference path)."""
    th = logits[:, :1]
    mask = logits > th
    if num_labels > 0:
        top_v = jax.lax.top_k(logits, num_labels)[0][:, num_labels - 1:num_labels]
        mask = mask & (logits >= top_v)
    out = jnp.where(mask, 1.0, 0.0).astype(logits.dtype)
    no_pos = (out.sum(axis=1) == 0.0).astype(logits.dtype)
    return out.at[:, 0].set(no_pos)


def init_params(key):
    keys = jax.random.split(key, 64)
    it = iter(keys)

    def w(shape, scale=0.02):
        return (scale * jax.random.normal(next(it), shape)).astype(jnp.float32)

    def enc_layer():
        return dict(
            Wq=w((EMB, EMB)), bq=jnp.zeros((EMB,), jnp.float32),
            Wk=w((EMB, EMB)), bk=jnp.zeros((EMB,), jnp.float32),
            Wv=w((EMB, EMB)), bv=jnp.zeros((EMB,), jnp.float32),
            Wo=w((EMB, EMB)), bo=jnp.zeros((EMB,), jnp.float32),
            W1=w((EMB, DFF)), b1=jnp.zeros((DFF,), jnp.float32),
            W2=w((DFF, EMB)), b2=jnp.zeros((EMB,), jnp.float32),
            ln1_s=jnp.ones((EMB,), jnp.float32), ln1_b=jnp.zeros((EMB,), jnp.float32),
            ln2_s=jnp.ones((EMB,), jnp.float32), ln2_b=jnp.zeros((EMB,), jnp.float32))

    p = {
        'head_w': w((2 * HIDDEN, EMB)), 'head_b': jnp.zeros((EMB,), jnp.float32),
        'tail_w': w((2 * HIDDEN, EMB)), 'tail_b': jnp.zeros((EMB,), jnp.float32),
        'bil_w': w((NUM_LABELS, EMB * BLOCK)), 'bil_b': jnp.zeros((NUM_LABELS,), jnp.float32),
        'enc1': [enc_layer(), enc_layer()],
        'enc2': [enc_layer(), enc_layer()],
    }
    return p


def docre_forward(params, packed_pair, seq_out, attention, rel_emb, entity_pos, hts):
    # --- get_hrt ---
    hss, tss, ht_att = get_hrt_glue(seq_out, attention, entity_pos, hts, offset=1)
    rs = rs_contract(ht_att, seq_out).reshape(-1, HIDDEN).astype(jnp.float32)  # Pallas kernel 1

    # --- rel-embedding transformer encoders ---
    # TODO(synk): original forward references undefined `rels` / `self.encoder_layer`;
    # interpreted as rels_sequence fed through encoder_layer_1/2 stacks.
    # NOTE: rs = rs + ress.mean(0) relies on HIDDEN == EMB and NUM_RELS == 1 broadcasting.
    ts_len = rel_emb.shape[0]
    ress = jnp.broadcast_to(rel_emb, (rel_emb.shape[0], ts_len, EMB))
    for lp in params['enc1']:
        ress = transformer_encoder_layer(ress, lp)
    for lp in params['enc2']:
        ress = transformer_encoder_layer(ress, lp)
    rs = rs + ress.mean(axis=0)

    # --- fused head/tail extractors + block-bilinear classifier (Pallas kernel 2) ---
    logits = pair_logits(hss, tss, rs, packed_pair)

    preds = at_loss_get_label(logits, num_labels=-1)    # labels=None inference branch
    return preds, logits, (hss, tss, rs)


# =================================== main ====================================
if __name__ == "__main__":
    key = jax.random.PRNGKey(0)
    k_seq, k_att, k_rel, k_par = jax.random.split(key, 4)

    # TODO(synk): encode()/encode_rel() run a pretrained HF encoder via
    # process_long_input; their outputs are synthesized here instead.
    seq_out = jax.random.normal(k_seq, (N_DOCS, SEQ, HIDDEN), jnp.float32)
    attention = jax.nn.softmax(
        jax.random.normal(k_att, (N_DOCS, HEADS_ATT, SEQ, SEQ), jnp.float32), axis=-1)
    rel_emb = jax.random.normal(k_rel, (NUM_RELS, 1, HIDDEN), jnp.float32)
    params = init_params(k_par)
    packed_pair = prepare_pair_params(params)   # hoisted one-time layout prep

    entity_pos = [
        [[(0, 2), (10, 12)], [(5, 7)], [(20, 22), (70, 72)], [(50, 52)]],
        [[(3, 5)], [(8, 10), (40, 42)], [(25, 27)], [(55, 57), (60, 62)]],
    ]
    # all 4x4 ordered entity pairs per doc -> 16 pairs/doc, 32 total
    hts = [[[a, b] for a in range(4) for b in range(4)] for _ in range(N_DOCS)]

    preds, logits, (hss, tss, rs) = docre_forward(
        params, packed_pair, seq_out, attention, rel_emb, entity_pos, hts)
    jax.block_until_ready((preds, logits))

    # ---- correctness checks of the Pallas hot paths ----
    def r16(x):  # bf16-round helper (kernels use bf16 operands, f32 accumulation)
        return x.astype(jnp.bfloat16).astype(jnp.float32)

    # 1) rs_contract vs precision-matched reference (kernel output is bf16)
    _, _, ht_att_chk = get_hrt_glue(seq_out, attention, entity_pos, hts, offset=1)
    ref_rs = jnp.einsum('nrc,nch->nrh', r16(ht_att_chk), r16(seq_out))
    got_rs = rs_contract(ht_att_chk, seq_out).astype(jnp.float32)
    np.testing.assert_allclose(np.asarray(got_rs), np.asarray(ref_rs),
                               rtol=1e-2, atol=2e-3)

    # 2) fused extractor + bilinear vs precision-matched reference
    hs_ref = jnp.tanh(jnp.concatenate([r16(hss), r16(rs)], 1) @ r16(params['head_w'])
                      + params['head_b'])
    ts_ref = jnp.tanh(jnp.concatenate([r16(tss), r16(rs)], 1) @ r16(params['tail_w'])
                      + params['tail_b'])
    N = hs_ref.shape[0]
    b1 = r16(hs_ref).reshape(N, EMB // BLOCK, BLOCK)
    b2 = r16(ts_ref).reshape(N, EMB // BLOCK, BLOCK)
    bl = r16((b1[:, :, :, None] * b2[:, :, None, :]).reshape(N, EMB * BLOCK))
    ref_logits = bl @ r16(params['bil_w']).T + params['bil_b']
    np.testing.assert_allclose(np.asarray(logits), np.asarray(ref_logits),
                               rtol=2e-2, atol=3e-4)

    # 3) loose semantic check vs the full-f32 module math (bf16 rounding only)
    hs_f = jnp.tanh(jnp.concatenate([hss, rs], 1) @ params['head_w'] + params['head_b'])
    ts_f = jnp.tanh(jnp.concatenate([tss, rs], 1) @ params['tail_w'] + params['tail_b'])
    b1f = hs_f.reshape(N, EMB // BLOCK, BLOCK)
    b2f = ts_f.reshape(N, EMB // BLOCK, BLOCK)
    blf = (b1f[:, :, :, None] * b2f[:, :, None, :]).reshape(N, EMB * BLOCK)
    ref_f32 = blf @ params['bil_w'].T + params['bil_b']
    np.testing.assert_allclose(np.asarray(logits), np.asarray(ref_f32),
                               rtol=5e-2, atol=5e-3)

    print("KERNEL_OK")
</pallas_src>

<mosaic_0001>
module attributes {stable_mosaic.version = 11 : i64} {
  func.func @_rs_contract_kernel(%arg0: i32, %arg1: memref<2x16x64xbf16, #tpu.memory_space<vmem>>, %arg2: memref<2x64x64xbf16, #tpu.memory_space<vmem>>, %arg3: memref<2x16x64xbf16, #tpu.memory_space<vmem>>) attributes {dimension_semantics = [#tpu.dimension_semantics<arbitrary>], iteration_bounds = array<i64: 1>, scalar_prefetch = 0 : i64, scratch_operands = 0 : i64, tpu.core_type = #tpu.core_type<tc>, window_params = [{pipeline_mode = #tpu.pipeline_mode<synchronous>, transform_indices = @transform_0, window_bounds = array<i64: 2, 16, 64>}, {pipeline_mode = #tpu.pipeline_mode<synchronous>, transform_indices = @transform_1, window_bounds = array<i64: 2, 64, 64>}, {pipeline_mode = #tpu.pipeline_mode<synchronous>, transform_indices = @transform_2, window_bounds = array<i64: 2, 16, 64>}]} {
    %c0 = arith.constant 0 : index
    %c0_0 = arith.constant 0 : index
    %c0_1 = arith.constant 0 : index
    %0 = vector.load %arg1[%c0, %c0_0, %c0_1] : memref<2x16x64xbf16, #tpu.memory_space<vmem>>, vector<2x16x64xbf16>
    %c0_2 = arith.constant 0 : index
    %c0_3 = arith.constant 0 : index
    %c0_4 = arith.constant 0 : index
    %1 = vector.load %arg2[%c0_2, %c0_3, %c0_4] : memref<2x64x64xbf16, #tpu.memory_space<vmem>>, vector<2x64x64xbf16>
    "tpu.trace_start"() <{level = 10 : i32, message = "nrc,nch->nrh"}> : () -> ()
    %cst = arith.constant dense<0.000000e+00> : vector<2x16x64xf32>
    %2 = tpu.matmul %0, %1, %cst {dimension_numbers = #tpu.dot_dimension_numbers<[2], [1], [1], [2], [0, 0, 0, 1, 1, 2], [0], [0]>} : vector<2x16x64xbf16>, vector<2x64x64xbf16>, vector<2x16x64xf32> -> vector<2x16x64xf32>
    "tpu.trace_stop"() : () -> ()
    %3 = arith.truncf %2 : vector<2x16x64xf32> to vector<2x16x64xbf16>
    %c0_5 = arith.constant 0 : index
    %c0_6 = arith.constant 0 : index
    %c0_7 = arith.constant 0 : index
    %4 = vector.load %arg3[%c0_5, %c0_6, %c0_7] : memref<2x16x64xbf16, #tpu.memory_space<vmem>>, vector<2x16x64xbf16>
    tpu.vector_store %arg3[%c0_5, %c0_6, %c0_7], %3 {strides = array<i32>} : memref<2x16x64xbf16, #tpu.memory_space<vmem>>, vector<2x16x64xbf16>,
    return
  }
  func.func @transform_0(%arg0: i32) -> (i32, i32, i32) {
    %c0_i32 = arith.constant 0 : i32
    %c0_i32_0 = arith.constant 0 : i32
    %c0_i32_1 = arith.constant 0 : i32
    %c0_i32_2 = arith.constant 0 : i32
    return %c0_i32, %c0_i32_0, %c0_i32_1 : i32, i32, i32
  }
  func.func @transform_1(%arg0: i32) -> (i32, i32, i32) {
    %c0_i32 = arith.constant 0 : i32
    %c0_i32_0 = arith.constant 0 : i32
    %c0_i32_1 = arith.constant 0 : i32
    %c0_i32_2 = arith.constant 0 : i32
    return %c0_i32, %c0_i32_0, %c0_i32_1 : i32, i32, i32
  }
  func.func @transform_2(%arg0: i32) -> (i32, i32, i32) {
    %c0_i32 = arith.constant 0 : i32
    %c0_i32_0 = arith.constant 0 : i32
    %c0_i32_1 = arith.constant 0 : i32
    %c0_i32_2 = arith.constant 0 : i32
    return %c0_i32, %c0_i32_0, %c0_i32_1 : i32, i32, i32
  }
}

</mosaic_0001>

<bundles_post_ra>
// kernel: tpu_custom_call.1
= control target key start
LH: loop header
LB: loop body
LE: loop exit
PB: predicated region body
PF: predicated region fallthrough
CT: control target
= control target key end

     0   :  { %7 = vsyncpa [#allocation3], 0  ;;  %s428_s0 = inlined_call_operand.hbm [shape: bf16[2,16,64], index: 0, kind: input, shape index: {}]   ;;  %s429_s1 = inlined_call_operand.hbm [shape: bf16[2,64,64], index: 1, kind: input, shape index: {}]   ;;  %s430_s2 = inlined_call_operand.hbm [shape: bf16[2,16,64], index: 2, kind: output, shape index: {}]  }
   0x1   :  { %8 = vsyncpa [#allocation6], 0 }
   0x2   :  { %9 = vsyncpa [#allocation4], 0  ;;  %s384_s9 = smov [#allocation2]  }
   0x3   :  { %s15_s10 = sshll.u32 %s384_s9, 4  ;;  %s16_s10 = int_to_ptr.vmem [resolvable:$true] %s15_s10 }
   0x4   :  { %s326_s11 = scalar_lea.vmem %s16_s10, 256  ;;  %p331_p1 = scmp.lt.s32.totalorder %s16_s10, %s16_s10 }
   0x5   :  { %p327_p0 = scmp.ne.s32.totalorder %s16_s10, %s326_s11  ;;  %p332_p2 = scmp.lt.s32.totalorder %s326_s11, %s326_s11 }
   0x7   :  { %p333_p3 = por %p332_p2, %p331_p1 }
   0x9   :  { %p334_p4 = pnand %p333_p3, %p327_p0 }
   0xb   :  { %337 = shalt.err (!%p334_p4)
}
   0xc   :  { %s385_s12 = smov 64   ;;  %s386_s13 = smov 4  }
   0xd   :  { %21 = dma.hbm_to_vmem [thread:$0]  %s428_s0, 256, %s16_s10, [#allocation3], %s385_s12, %s385_s12, %s386_s13  }
   0xe   :  { %s387_s16 = smov [#allocation5]  }
   0xf   :  { %s27_s17 = sshll.u32 %s387_s16, 4  ;;  %s28_s17 = int_to_ptr.vmem [resolvable:$true] %s27_s17 }
  0x10   :  { %s346_s18 = scalar_lea.vmem %s28_s17, 1024  ;;  %p351_p6 = scmp.lt.s32.totalorder %s28_s17, %s28_s17 }
  0x11   :  { %p347_p5 = scmp.ne.s32.totalorder %s28_s17, %s346_s18  ;;  %p352_p7 = scmp.lt.s32.totalorder %s346_s18, %s346_s18 }
  0x13   :  { %p353_p8 = por %p352_p7, %p351_p6 }
  0x15   :  { %p354_p9 = pnand %p353_p8, %p347_p5 }
  0x17   :  { %357 = shalt.err (!%p354_p9)
}
  0x18   :  { %33 = dma.hbm_to_vmem [thread:$0]  %s429_s1, 1024, %s28_s17, [#allocation6], %s385_s12, %s385_s12, %s386_s13  }
  0x19   :  { %378 = dma.done.wait [#allocation3], 256  }
  0x1a   :  { %379 = vsyncadd [#allocation3], 4294967040 }
  0x1b   :  { %380 = dma.done.wait [#allocation6], 1024  }
  0x1c   :  { %381 = vsyncadd [#allocation6], 4294966272  ;;  %v388_v0 = vmov 0.0   ;;  %vm389_vm0 = vmmov 0   ;;  %v308_v1 = vld [vmem:[#allocation5 + $0x18] sm:$0xff]   ;;  %v310_v3 = vld [vmem:[#allocation5 + $0x10] sm:$0xff]  }
  0x1d   :  { %277 = vmatprep.subr.bf16.mxu0 %v388_v0  ;;  %289 = vmatprep.subr.bf16.mxu1 %v388_v0  ;;  %v309_v2 = vld [vmem:[#allocation5 + $0x38] sm:$0xff]   ;;  %v311_v4 = vld [vmem:[#allocation5 + $0x30] sm:$0xff]   ;;  %v312_v5 = vld [vmem:[#allocation5 + $0x8] sm:$0xff]   ;;  %vm90_vm1 = vcmask 523264   ;;  %vm224_vm2 = vcmask 519168   ;;  %s390_s0 = smov [#allocation7]  }
  0x1e   :  { %285 = vmatprep.mubr.msk.bf16.mxu0 %vm389_vm0, %v388_v0  ;;  %297 = vmatprep.mubr.msk.bf16.mxu1 %vm389_vm0, %v388_v0  ;;  %v313_v6 = vld [vmem:[#allocation5 + $0x28] sm:$0xff]   ;;  %v314_v7 = vld [vmem:[#allocation5] sm:$0xff]   ;;  %v316_v9 = vld [vmem:[#allocation2] sm:$0xff]   ;;  %s234_s1 = sshll.u32 %s390_s0, 4  ;;  %s235_s1 = int_to_ptr.vmem [resolvable:$true] %s234_s1 }
  0x1f   :  { %278 = vmatpush3.bf16.msra.mxu0 %v308_v1  ;;  %290 = vmatpush3.bf16.msra.mxu1 %v309_v2  ;;  %v315_v8 = vld [vmem:[#allocation5 + $0x20] sm:$0xff]   ;;  %v317_v10 = vld [vmem:[#allocation2 + $0x8] sm:$0xff]   ;;  %s358_s21 = scalar_lea.vmem %s235_s1, 256  ;;  %p363_p11 = scmp.lt.s32.totalorder %s235_s1, %s235_s1 }
  0x20   :  { %279 = vmatprep.subr.bf16.mxu0 %v388_v0  ;;  %291 = vmatprep.subr.bf16.mxu1 %v388_v0  ;;  %p359_p10 = scmp.ne.s32.totalorder %s235_s1, %s358_s21  ;;  %p364_p12 = scmp.lt.s32.totalorder %s358_s21, %s358_s21 }
  0x22   :  { %p365_p13 = por %p364_p12, %p363_p11 }
  0x23   :  { %280 = vmatpush3.bf16.msra.mxu0 %v310_v3  ;;  %292 = vmatpush3.bf16.msra.mxu1 %v311_v4 }
  0x24   :  { %281 = vmatprep.subr.bf16.mxu0 %v388_v0  ;;  %293 = vmatprep.subr.bf16.mxu1 %v388_v0  ;;  %p366_p0 = pnand %p365_p13, %p359_p10 }
  0x27   :  { %282 = vmatpush3.bf16.msra.mxu0 %v312_v5  ;;  %294 = vmatpush3.bf16.msra.mxu1 %v313_v6 }
  0x28   :  { %283 = vmatprep.subr.bf16.mxu0 %v388_v0  ;;  %295 = vmatprep.subr.bf16.mxu1 %v388_v0 }
  0x2b   :  { %284 = vmatpush3.bf16.msra.mxu0 %v314_v7  ;;  %296 = vmatpush3.bf16.msra.mxu1 %v315_v8 }
  0x2e   :  { %286 = vmatmul.mubr.msk.bf16.vlgmr.msra.gmra.mxu0 %vm90_vm1, %v316_v9  ;;  %298 = vmatmul.mubr.msk.bf16.vlgmr.msra.gmra.mxu1 %vm90_vm1, %v317_v10 }
  0xee   :  { %v128_v11 = vpop.f32.mrf.mxu0  ;;  %v201_v13 = vpop.f32.mrf.mxu1 }
  0xef   :  { %v263_v12 = vpack.c.bf16 %v128_v11, %v128_v11  ;;  %v265_v14 = vpack.c.bf16 %v201_v13, %v201_v13 }
  0xf0   :  { %v287_v15 = vpop.f32.mrf.mxu0  ;;  %v299_v16 = vpop.f32.mrf.mxu1 }
  0xf1   :  { %225 = vst.msk [vmem:[#allocation7] sm:$0xf] %vm224_vm2, %v263_v12  ;;  %227 = vst.msk [vmem:[#allocation7 + $0x8] sm:$0xf] %vm224_vm2, %v265_v14 }
  0xf2   :  { %v131_v17 = vpop.f32.mrf.mxu0  ;;  %v204_v19 = vpop.f32.mrf.mxu1 }
  0xf3   :  { %v264_v18 = vpack.c.bf16 %v131_v17, %v131_v17  ;;  %v266_v20 = vpack.c.bf16 %v204_v19, %v204_v19 }
  0xf4   :  { %v288_v21 = vpop.f32.mrf.mxu0  ;;  %v300_v22 = vpop.f32.mrf.mxu1 }
  0xf5   :  { %226 = vst.msk [vmem:[#allocation7 + $0x4] sm:$0xf] %vm224_vm2, %v264_v18  ;;  %228 = vst.msk [vmem:[#allocation7 + $0xc] sm:$0xf] %vm224_vm2, %v266_v20 }
  0xf6   :  { %369 = shalt.err (!%p366_p0)
}
  0xf7   :  { %240 = dma.vmem_to_hbm [thread:$0]  %s235_s1, 256, %s430_s2, [#allocation4], %s385_s12, %s385_s12, %s386_s13  }
  0xf8   :  { %382 = dma.done.wait [#allocation4], 256  }
  0xf9   :  { %383 = vsyncadd [#allocation4], 4294967040 }
  0xfa   :  { %244 = vsyncpa [#allocation3], 1 }
  0xfb   :  { %245 = vsyncpa [#allocation6], 1 }
  0xfc   :  { %246 = vsyncpa [#allocation4], 1 }

</bundles_post_ra>
